<compile_context>
chip_gen: v7x
topology: tpu7x:2x2x1
jax: 0.10.0
libtpu: 0.0.40
codegen_flags: <defaults>
</compile_context>

<pallas_src>
import math

import jax
import jax.numpy as jnp
from jax.experimental import pallas as pl
from jax.experimental.pallas import tpu as pltpu


# ---------------------------------------------------------------------------
# Module hyper-parameters (deterministic, synthetic init — no checkpoint).
# ---------------------------------------------------------------------------
NUMBER_EMBEDDING_DIM = 32          # number_embedding_dim
INTERNAL_DIM = 256                 # internal_dim (must be even)
HALF_DIM = INTERNAL_DIM // 2       # 128 -> one full lane width
MIN_VALUE = 0.0
MAX_VALUE = 30.0
INV_RANGE = 1.0 / (MAX_VALUE - MIN_VALUE)

_BT_CAP = 2048                     # max batch tile (multiple of 8)


def _duration_embed_kernel(floats_ref, freq_phase_ref, wsincos_ref,
                           wtime_bias_ref, out_ref):
    """All compute for DurationEmbedder.forward in VMEM.

    floats_ref     : (Bt, 1)               raw seconds
    freq_phase_ref : (2, INTERNAL_DIM)      row0 = [w, w] * 2*pi   (fused sin/cos freqs)
                                            row1 = [0..0, pi/2..]  (cos(x) == sin(x+pi/2))
    wsincos_ref    : (INTERNAL_DIM, D)      Linear weight rows for [sin | cos] features
    wtime_bias_ref : (2, D)                 row0 = Linear weight column for `times`
                                            row1 = Linear bias
    out_ref        : (Bt, D)
    """
    x = floats_ref[...]                                   # (Bt, 1)
    x = jnp.clip(x, MIN_VALUE, MAX_VALUE)
    t = (x - MIN_VALUE) * INV_RANGE                       # normalized times, (Bt, 1)

    w_comb = freq_phase_ref[0:1, :]                       # (1, INTERNAL_DIM)
    phase = freq_phase_ref[1:2, :]                        # (1, INTERNAL_DIM)
    # [sin(freqs) | cos(freqs)] in one EUP pass: sin(t*w*2pi + phase)
    fouriered = jnp.sin(t * w_comb + phase)               # (Bt, INTERNAL_DIM)

    w_time = wtime_bias_ref[0:1, :]                       # (1, D)
    bias = wtime_bias_ref[1:2, :]                         # (1, D)

    # Linear over concat([times, sin, cos]): rank-1 `times` term on the VPU,
    # a single K=256 MXU contraction for the fourier part.
    out = (t * w_time
           + jnp.dot(fouriered, wsincos_ref[...],
                     preferred_element_type=jnp.float32)
           + bias)
    out_ref[...] = out.astype(out_ref.dtype)


def prepare_duration_embedder_params(pos_weights, linear_weight, linear_bias):
    """One-time weight preparation (hoisted off the per-call path).

    pos_weights   : (HALF_DIM,)                              — StableAudioPositionalEmbedding.weights
    linear_weight : (NUMBER_EMBEDDING_DIM, INTERNAL_DIM + 1) — nn.Linear weight (out, in)
    linear_bias   : (NUMBER_EMBEDDING_DIM,)
    """
    # nn.Linear computes x @ W.T + b; "in" axis order is [times, sin(128), cos(128)].
    w_t = linear_weight.T.astype(jnp.float32)                  # (INTERNAL_DIM+1, D)
    w_sincos = w_t[1:, :]                                      # (INTERNAL_DIM, D)
    wtime_bias = jnp.stack(
        [w_t[0, :], linear_bias.astype(jnp.float32)], axis=0)  # (2, D)

    w = pos_weights.astype(jnp.float32)
    w_comb = jnp.concatenate([w, w]) * (2.0 * math.pi)         # (INTERNAL_DIM,)
    phase = jnp.concatenate(
        [jnp.zeros((HALF_DIM,), jnp.float32),
         jnp.full((HALF_DIM,), math.pi / 2.0, jnp.float32)])   # (INTERNAL_DIM,)
    freq_phase = jnp.stack([w_comb, phase], axis=0)            # (2, INTERNAL_DIM)

    # Materialize now so none of this runs per forward call.
    return tuple(jax.block_until_ready(p)
                 for p in (freq_phase, w_sincos, wtime_bias))


def _round_up(x, m):
    return ((x + m - 1) // m) * m


def _pick_batch_tile(B):
    """Batch tile: multiple of 8 sublanes; >= 2 grid steps once B > 64 so the
    ("parallel",) axis can shard across v7x's two TensorCores; capped so the
    per-step footprint stays tiny while step-count overhead is amortized."""
    if B <= 64:
        return _round_up(max(B, 1), 8)
    return min(_BT_CAP, _round_up(pl.cdiv(B, 2), 8))


@jax.jit
def duration_embedder(floats, params):
    """Pallas forward reproducing DurationEmbedder.forward.

    floats : (B,) float32 seconds
    params : output of prepare_duration_embedder_params
    returns: (B, 1, NUMBER_EMBEDDING_DIM)
    """
    freq_phase, w_sincos, wtime_bias = params
    B = floats.shape[0]
    D = NUMBER_EMBEDDING_DIM

    Bt = _pick_batch_tile(B)
    B_pad = _round_up(B, Bt)

    floats2d = floats.astype(jnp.float32).reshape(B, 1)
    if B_pad != B:
        floats2d = jnp.pad(floats2d, ((0, B_pad - B), (0, 0)))

    # Grid-invariant weights: block index never changes -> single buffer.
    resident = lambda shape: pl.BlockSpec(shape, lambda i: (0, 0),
                                          pipeline_mode=pl.Buffered(1))

    out = pl.pallas_call(
        _duration_embed_kernel,
        out_shape=jax.ShapeDtypeStruct((B_pad, D), jnp.float32),
        grid=(B_pad // Bt,),
        in_specs=[
            pl.BlockSpec((Bt, 1), lambda i: (i, 0)),   # floats
            resident((2, INTERNAL_DIM)),               # [w_comb ; phase]
            resident((INTERNAL_DIM, D)),               # w_sincos
            resident((2, D)),                          # [w_time ; bias]
        ],
        out_specs=pl.BlockSpec((Bt, D), lambda i: (i, 0)),
        compiler_params=pltpu.CompilerParams(
            dimension_semantics=("parallel",)),
    )(floats2d, freq_phase, w_sincos, wtime_bias)

    # float_embeds = embedding.view(-1, 1, number_embedding_dim)
    # Row-only slice (a no-op when B is a multiple of the batch tile);
    # the padded rows are never consumed downstream.
    return out[:B].reshape(-1, 1, D)


def _reference(floats, pos_weights, linear_weight, linear_bias):
    """Pure-JAX reference mirroring the PyTorch code path."""
    x = jnp.clip(floats.astype(jnp.float32), MIN_VALUE, MAX_VALUE)
    t = (x - MIN_VALUE) / (MAX_VALUE - MIN_VALUE)
    times = t[..., None]                                      # (B, 1)
    freqs = times * pos_weights[None, :] * 2.0 * math.pi      # (B, HALF_DIM)
    fouriered = jnp.concatenate([jnp.sin(freqs), jnp.cos(freqs)], axis=-1)
    fouriered = jnp.concatenate([times, fouriered], axis=-1)  # (B, INTERNAL_DIM+1)
    emb = fouriered @ linear_weight.T + linear_bias           # (B, D)
    return emb.reshape(-1, 1, NUMBER_EMBEDDING_DIM)


if __name__ == "__main__":
    key = jax.random.PRNGKey(0)
    k_f, k_w, k_lw, k_lb = jax.random.split(key, 4)

    # Deterministic synthetic parameters (shapes from the module __init__).
    pos_weights = jax.random.normal(k_w, (HALF_DIM,), dtype=jnp.float32)
    bound = 1.0 / math.sqrt(INTERNAL_DIM + 1)
    linear_weight = jax.random.uniform(
        k_lw, (NUMBER_EMBEDDING_DIM, INTERNAL_DIM + 1),
        minval=-bound, maxval=bound, dtype=jnp.float32)
    linear_bias = jax.random.uniform(
        k_lb, (NUMBER_EMBEDDING_DIM,),
        minval=-bound, maxval=bound, dtype=jnp.float32)

    # One-time weight prep (off the per-call path).
    params = prepare_duration_embedder_params(pos_weights, linear_weight, linear_bias)

    # Small-batch case (single grid step).
    B = 8
    # Example "duration in seconds" inputs, some outside [MIN, MAX] to exercise clamp.
    floats = jax.random.uniform(k_f, (B,), minval=-5.0, maxval=40.0,
                                dtype=jnp.float32)
    out = jax.block_until_ready(duration_embedder(floats, params))
    ref = _reference(floats, pos_weights, linear_weight, linear_bias)
    assert out.shape == (B, 1, NUMBER_EMBEDDING_DIM), out.shape
    assert jnp.allclose(out, ref, atol=1e-4, rtol=1e-4), \
        float(jnp.max(jnp.abs(out - ref)))

    # Larger batch exercising the >= 2-step ("parallel") grid and row padding.
    B2 = 200
    floats2 = jax.random.uniform(jax.random.PRNGKey(1), (B2,),
                                 minval=-5.0, maxval=40.0, dtype=jnp.float32)
    out2 = jax.block_until_ready(duration_embedder(floats2, params))
    ref2 = _reference(floats2, pos_weights, linear_weight, linear_bias)
    assert out2.shape == (B2, 1, NUMBER_EMBEDDING_DIM), out2.shape
    assert jnp.allclose(out2, ref2, atol=1e-4, rtol=1e-4), \
        float(jnp.max(jnp.abs(out2 - ref2)))

    print("KERNEL_OK")
</pallas_src>

<mosaic_0001>
module attributes {stable_mosaic.version = 11 : i64} {
  func.func @_duration_embed_kernel(%arg0: i32, %arg1: memref<8x1xf32, #tpu.memory_space<vmem>>, %arg2: memref<2x256xf32, #tpu.memory_space<vmem>>, %arg3: memref<256x32xf32, #tpu.memory_space<vmem>>, %arg4: memref<2x32xf32, #tpu.memory_space<vmem>>, %arg5: memref<8x32xf32, #tpu.memory_space<vmem>>) attributes {dimension_semantics = [#tpu.dimension_semantics<parallel>], iteration_bounds = array<i64: 1>, scalar_prefetch = 0 : i64, scratch_operands = 0 : i64, tpu.core_type = #tpu.core_type<tc>, window_params = [{transform_indices = @transform_0, window_bounds = array<i64: 8, 1>}, {pipeline_mode = #tpu.pipeline_mode<synchronous>, transform_indices = @transform_1, window_bounds = array<i64: 2, 256>}, {pipeline_mode = #tpu.pipeline_mode<synchronous>, transform_indices = @transform_2, window_bounds = array<i64: 256, 32>}, {pipeline_mode = #tpu.pipeline_mode<synchronous>, transform_indices = @transform_3, window_bounds = array<i64: 2, 32>}, {transform_indices = @transform_4, window_bounds = array<i64: 8, 32>}]} {
    %c0 = arith.constant 0 : index
    %c0_0 = arith.constant 0 : index
    %0 = vector.load %arg1[%c0, %c0_0] : memref<8x1xf32, #tpu.memory_space<vmem>>, vector<8x1xf32>
    %cst = arith.constant 0.000000e+00 : f32
    %cst_1 = arith.constant 3.000000e+01 : f32
    %1 = vector.broadcast %cst : f32 to vector<8x1xf32>
    %2 = arith.maximumf %1, %0 : vector<8x1xf32>
    %3 = vector.broadcast %cst_1 : f32 to vector<8x1xf32>
    %4 = arith.minimumf %3, %2 : vector<8x1xf32>
    %cst_2 = arith.constant 0.000000e+00 : f32
    %5 = vector.broadcast %cst_2 : f32 to vector<8x1xf32>
    %6 = arith.subf %4, %5 : vector<8x1xf32>
    %cst_3 = arith.constant 0.0333333351 : f32
    %7 = vector.broadcast %cst_3 : f32 to vector<8x1xf32>
    %8 = arith.mulf %6, %7 : vector<8x1xf32>
    %c0_4 = arith.constant 0 : index
    %c0_5 = arith.constant 0 : index
    %9 = vector.load %arg2[%c0_4, %c0_5] : memref<2x256xf32, #tpu.memory_space<vmem>>, vector<1x256xf32>
    %c1 = arith.constant 1 : index
    %c0_6 = arith.constant 0 : index
    %10 = vector.load %arg2[%c1, %c0_6] : memref<2x256xf32, #tpu.memory_space<vmem>>, vector<1x256xf32>
    %11 = vector.broadcast %8 : vector<8x1xf32> to vector<8x256xf32>
    %12 = vector.broadcast %9 : vector<1x256xf32> to vector<8x256xf32>
    %13 = arith.mulf %11, %12 : vector<8x256xf32>
    %14 = vector.broadcast %10 : vector<1x256xf32> to vector<8x256xf32>
    %15 = arith.addf %13, %14 : vector<8x256xf32>
    %16 = math.sin %15 : vector<8x256xf32>
    %c0_7 = arith.constant 0 : index
    %c0_8 = arith.constant 0 : index
    %17 = vector.load %arg4[%c0_7, %c0_8] : memref<2x32xf32, #tpu.memory_space<vmem>>, vector<1x32xf32>
    %c1_9 = arith.constant 1 : index
    %c0_10 = arith.constant 0 : index
    %18 = vector.load %arg4[%c1_9, %c0_10] : memref<2x32xf32, #tpu.memory_space<vmem>>, vector<1x32xf32>
    %19 = vector.broadcast %8 : vector<8x1xf32> to vector<8x32xf32>
    %20 = vector.broadcast %17 : vector<1x32xf32> to vector<8x32xf32>
    %21 = arith.mulf %19, %20 : vector<8x32xf32>
    %c0_11 = arith.constant 0 : index
    %c0_12 = arith.constant 0 : index
    %22 = vector.load %arg3[%c0_11, %c0_12] : memref<256x32xf32, #tpu.memory_space<vmem>>, vector<256x32xf32>
    %cst_13 = arith.constant dense<0.000000e+00> : vector<8x32xf32>
    %23 = tpu.matmul %16, %22, %cst_13 {dimension_numbers = #tpu.dot_dimension_numbers<[1], [0], [0], [1], [0, 0, 1, 1], [], []>} : vector<8x256xf32>, vector<256x32xf32>, vector<8x32xf32> -> vector<8x32xf32>
    %24 = arith.addf %21, %23 : vector<8x32xf32>
    %25 = vector.broadcast %18 : vector<1x32xf32> to vector<8x32xf32>
    %26 = arith.addf %24, %25 : vector<8x32xf32>
    %c0_14 = arith.constant 0 : index
    %c0_15 = arith.constant 0 : index
    %27 = vector.load %arg5[%c0_14, %c0_15] : memref<8x32xf32, #tpu.memory_space<vmem>>, vector<8x32xf32>
    tpu.vector_store %arg5[%c0_14, %c0_15], %26 {strides = array<i32>} : memref<8x32xf32, #tpu.memory_space<vmem>>, vector<8x32xf32>,
    return
  }
  func.func @transform_0(%arg0: i32) -> (i32, i32) {
    %c0_i32 = arith.constant 0 : i32
    %c0_i32_0 = arith.constant 0 : i32
    return %arg0, %c0_i32 : i32, i32
  }
  func.func @transform_1(%arg0: i32) -> (i32, i32) {
    %c0_i32 = arith.constant 0 : i32
    %c0_i32_0 = arith.constant 0 : i32
    %c0_i32_1 = arith.constant 0 : i32
    return %c0_i32, %c0_i32_0 : i32, i32
  }
  func.func @transform_2(%arg0: i32) -> (i32, i32) {
    %c0_i32 = arith.constant 0 : i32
    %c0_i32_0 = arith.constant 0 : i32
    %c0_i32_1 = arith.constant 0 : i32
    return %c0_i32, %c0_i32_0 : i32, i32
  }
  func.func @transform_3(%arg0: i32) -> (i32, i32) {
    %c0_i32 = arith.constant 0 : i32
    %c0_i32_0 = arith.constant 0 : i32
    %c0_i32_1 = arith.constant 0 : i32
    return %c0_i32, %c0_i32_0 : i32, i32
  }
  func.func @transform_4(%arg0: i32) -> (i32, i32) {
    %c0_i32 = arith.constant 0 : i32
    %c0_i32_0 = arith.constant 0 : i32
    return %arg0, %c0_i32 : i32, i32
  }
}

</mosaic_0001>

<bundles_post_ra>
// kernel: duration_embedder.1
= control target key start
LH: loop header
LB: loop body
LE: loop exit
PB: predicated region body
PF: predicated region fallthrough
CT: control target
= control target key end

     0   :  { %v522_v1 = vmov 0   ;;  %s749_s0 = inlined_call_operand.vmem [shape: f32[8,1], index: 0, kind: input, shape index: {}]   ;;  %s750_s1 = inlined_call_operand.vmem [shape: f32[2,256], index: 1, kind: input, shape index: {}]   ;;  %s751_s2 = inlined_call_operand.vmem [shape: f32[256,32], index: 2, kind: input, shape index: {}]   ;;  %s752_s3 = inlined_call_operand.vmem [shape: f32[2,32], index: 3, kind: input, shape index: {}]   ;;  %s753_s4 = inlined_call_operand.hbm [shape: f32[8,32], index: 4, kind: output, shape index: {}]  }
   0x1   :  { %v18_v0 = vld [vmem:[%s749_s0] sm:$0xff]  ;;  %489 = vset.pattern.permute.xlu0 %v522_v1 }
   0x2   :  { %v19_v2 = vmax.f32 %v18_v0, 0.0 }
   0x3   :  { %9 = vsyncpa [#allocation3], 0  ;;  %v287_v5 = vld [vmem:[%s751_s2 + $0x80] sm:$0xff]  ;;  %v288_v6 = vld [vmem:[%s751_s2 + $0x88] sm:$0xff]  ;;  %v31_v53 = vlaneseq  ;;  %s529_s6 = smov [#allocation2]  }
   0x4   :  { %v20_v3 = vmin.f32 %v19_v2, 30.0  ;;  %v271_v7 = vld [vmem:[%s751_s2] sm:$0xff]  ;;  %v441_v8 = vpack.c.bf16 %v288_v6, %v287_v5  ;;  %v272_v9 = vld [vmem:[%s751_s2 + $0x8] sm:$0xff]  ;;  %v289_v10 = vld [vmem:[%s751_s2 + $0x90] sm:$0xff]  ;;  %s387_s7 = sshll.u32 %s529_s6, 4  ;;  %s388_s7 = int_to_ptr.vmem [resolvable:$true] %s387_s7 }
   0x5   :  { %v290_v11 = vld [vmem:[%s751_s2 + $0x98] sm:$0xff]  ;;  %v443_v12 = vpack.c.bf16 %v272_v9, %v271_v7  ;;  %v273_v14 = vld [vmem:[%s751_s2 + $0x10] sm:$0xff]  ;;  %v291_v16 = vld [vmem:[%s751_s2 + $0xa0] sm:$0xff]  ;;  %v32_v54 = vshrl.u32 %v31_v53, 7  ;;  %s498_s8 = scalar_lea.vmem %s388_s7, 128  ;;  %p503_p1 = scmp.lt.s32.totalorder %s388_s7, %s388_s7 }
   0x6   :  { %v21_v4 = vmul.f32 0.033333335, %v20_v3  ;;  %v445_v13 = vpack.c.bf16 %v290_v11, %v289_v10  ;;  %v274_v15 = vld [vmem:[%s751_s2 + $0x18] sm:$0xff]  ;;  %442 = vmatprep.subr.bf16.mxu0 %v441_v8  ;;  %v292_v17 = vld [vmem:[%s751_s2 + $0xa8] sm:$0xff]  ;;  %v275_v20 = vld [vmem:[%s751_s2 + $0x20] sm:$0xff]  ;;  %p499_p0 = scmp.ne.s32.totalorder %s388_s7, %s498_s8  ;;  %p504_p2 = scmp.lt.s32.totalorder %s498_s8, %s498_s8 }
   0x7   :  { %444 = vmatpush3.bf16.msra.mxu0 %v443_v12  ;;  %v447_v18 = vpack.c.bf16 %v274_v15, %v273_v14  ;;  %v449_v19 = vpack.c.bf16 %v292_v17, %v291_v16  ;;  %v276_v21 = vld [vmem:[%s751_s2 + $0x28] sm:$0xff]  ;;  %v293_v22 = vld [vmem:[%s751_s2 + $0xb0] sm:$0xff]  ;;  %v294_v23 = vld [vmem:[%s751_s2 + $0xb8] sm:$0xff]  ;;  %v33_v55 = vsub.s32 0, %v32_v54  ;;  %v37_v56 = vsub.s32 1, %v32_v54 }
   0x8   :  { %27 = vperm.xlu0 %489, %v21_v4   ;;  %446 = vmatprep.subr.bf16.mxu0 %v445_v13  ;;  %v451_v24 = vpack.c.bf16 %v276_v21, %v275_v20  ;;  %v453_v25 = vpack.c.bf16 %v294_v23, %v293_v22  ;;  %v277_v26 = vld [vmem:[%s751_s2 + $0x30] sm:$0xff]  ;;  %v278_v27 = vld [vmem:[%s751_s2 + $0x38] sm:$0xff]  ;;  %v295_v28 = vld [vmem:[%s751_s2 + $0xc0] sm:$0xff]  ;;  %p505_p3 = por %p504_p2, %p503_p1 }
   0x9   :  { %v296_v29 = vld [vmem:[%s751_s2 + $0xc8] sm:$0xff]  ;;  %v455_v30 = vpack.c.bf16 %v278_v27, %v277_v26  ;;  %v279_v32 = vld [vmem:[%s751_s2 + $0x40] sm:$0xff]  ;;  %v297_v34 = vld [vmem:[%s751_s2 + $0xd0] sm:$0xff] }
   0xa   :  { %v457_v31 = vpack.c.bf16 %v296_v29, %v295_v28  ;;  %v280_v33 = vld [vmem:[%s751_s2 + $0x48] sm:$0xff]  ;;  %v298_v35 = vld [vmem:[%s751_s2 + $0xd8] sm:$0xff]  ;;  %v281_v38 = vld [vmem:[%s751_s2 + $0x50] sm:$0xff]  ;;  %v523_v28 = vmov 683565275   ;;  %p506_p4 = pnand %p505_p3, %p499_p0 }
   0xb   :  { %448 = vmatpush3.bf16.msra.mxu0 %v447_v18  ;;  %v459_v36 = vpack.c.bf16 %v280_v33, %v279_v32  ;;  %v461_v37 = vpack.c.bf16 %v298_v35, %v297_v34  ;;  %v282_v39 = vld [vmem:[%s751_s2 + $0x58] sm:$0xff]  ;;  %v299_v40 = vld [vmem:[%s751_s2 + $0xe0] sm:$0xff]  ;;  %v300_v41 = vld [vmem:[%s751_s2 + $0xe8] sm:$0xff]  ;;  %v525_v32 = vmov 2131351028  }
   0xc   :  { %450 = vmatprep.subr.bf16.mxu0 %v449_v19  ;;  %v463_v42 = vpack.c.bf16 %v282_v39, %v281_v38  ;;  %v465_v43 = vpack.c.bf16 %v300_v41, %v299_v40  ;;  %v283_v44 = vld [vmem:[%s751_s2 + $0x60] sm:$0xff]  ;;  %v284_v45 = vld [vmem:[%s751_s2 + $0x68] sm:$0xff]  ;;  %v301_v46 = vld [vmem:[%s751_s2 + $0xf0] sm:$0xff]  ;;  %v527_v39 = vmov 920167782  }
   0xd   :  { %v302_v47 = vld [vmem:[%s751_s2 + $0xf8] sm:$0xff]  ;;  %v467_v48 = vpack.c.bf16 %v284_v45, %v283_v44  ;;  %v285_v50 = vld [vmem:[%s751_s2 + $0x70] sm:$0xff]  ;;  %v22_v57 = vld [vmem:[%s750_s1] ss:$2 sm:$0x3] }
   0xe   :  { %v469_v49 = vpack.c.bf16 %v302_v47, %v301_v46  ;;  %v286_v51 = vld [vmem:[%s751_s2 + $0x78] sm:$0xff]  ;;  %v395_v58 = vld [vmem:[%s750_s1 + $0x1] ss:$2 sm:$0x3]  ;;  %v34_v59 = vrot.slane %v22_v57, %v33_v55  ;;  %v38_v60 = vrot.slane %v22_v57, %v37_v56 }
   0xf   :  { %452 = vmatpush3.bf16.msra.mxu0 %v451_v24  ;;  %v471_v52 = vpack.c.bf16 %v286_v51, %v285_v50  ;;  %v47_v61 = vrot.slane %v395_v58, %v33_v55  ;;  %v51_v62 = vrot.slane %v395_v58, %v37_v56 }
  0x10   :  { %454 = vmatprep.subr.bf16.mxu0 %v453_v25 }
  0x13   :  { %456 = vmatpush3.bf16.msra.mxu0 %v455_v30  ;;  %v524_v30 = vmov 2475754826  }
  0x14   :  { %458 = vmatprep.subr.bf16.mxu0 %v457_v31 }
  0x17   :  { %460 = vmatpush3.bf16.msra.mxu0 %v459_v36  ;;  %v526_v36 = vmov 2102212464  }
  0x18   :  { %462 = vmatprep.subr.bf16.mxu0 %v461_v37 }
  0x1b   :  { %464 = vmatpush3.bf16.msra.mxu0 %v463_v42  ;;  %v528_v42 = vmov 1326507024  }
  0x1c   :  { %466 = vmatprep.subr.bf16.mxu0 %v465_v43 }
  0x1f   :  { %468 = vmatpush3.bf16.msra.mxu0 %v467_v48 }
  0x20   :  { %470 = vmatprep.subr.bf16.mxu0 %v469_v49 }
  0x23   :  { %472 = vmatpush3.bf16.msra.mxu0 %v471_v52 }
  0x87   :  { %v660_v63 = vpop.permute.xlu0 %27 }
  0x88   :  { %v41_v0 = vmul.f32 %v34_v59, %v660_v63  ;;  %v42_v1 = vmul.f32 %v38_v60, %v660_v63 }
  0x8a   :  { %v664_v2 = vadd.f32 %v47_v61, %v41_v0  ;;  %v666_v3 = vadd.f32 %v51_v62, %v42_v1 }
  0x8c   :  { %v59_v4 = vand.u32 2139095040, %v664_v2  ;;  %v163_v5 = vand.u32 2139095040, %v666_v3  ;;  %v160_v6 = vand.u32 2147483647, %v666_v3  ;;  %v56_v7 = vand.u32 2147483647, %v664_v2 }
  0x8d   :  { %vm162_vm14 = vcmp.lt.s32.totalorder %v666_v3, 0 }
  0x8e   :  { %v60_v8 = vshrl.u32 %v59_v4, 23  ;;  %v164_v9 = vshrl.u32 %v163_v5, 23  ;;  %v167_v12 = vand.u32 8388607, %v160_v6  ;;  %v63_v13 = vand.u32 8388607, %v56_v7 }
  0x8f   :  { %vm161_vm15 = vcmp.le.f32.partialorder %v160_v6, 0.7853982 }
  0x90   :  { %v396_v10 = vadd.s32 4294967169, %v60_v8  ;;  %v400_v11 = vadd.s32 4294967169, %v164_v9  ;;  %v168_v16 = vor.u32 8388608, %v167_v12  ;;  %v64_v17 = vor.u32 8388608, %v63_v13 }
  0x92   :  { %v66_v14 = vadd.s32 1, %v396_v10  ;;  %v170_v15 = vadd.s32 1, %v400_v11  ;;  %v680_v25 = vshll.u32 %v168_v16, 8  ;;  %v682_v26 = vshll.u32 %v64_v17, 8 }
  0x94   :  { %vm67_vm0 = vcmp.gt.s32.totalorder %v66_v14, 0  ;;  %vm171_vm1 = vcmp.gt.s32.totalorder %v170_v15, 0 }
  0x95   :  { %v68_v18 = vsel %vm67_vm0, %v66_v14, 0  ;;  %v172_v19 = vsel %vm171_vm1, %v170_v15, 0  ;;  %vm58_vm0 = vcmp.lt.s32.totalorder %v664_v2, 0  ;;  %vm57_vm1 = vcmp.le.f32.partialorder %v56_v7, 0.7853982 }
  0x96   :  { %v676_v20 = vand.u32 31, %v68_v18  ;;  %v174_v21 = vand.u32 31, %v172_v19  ;;  %v173_v22 = vshrl.u32 %v172_v19, 5  ;;  %v678_v23 = vshrl.u32 %v68_v18, 5 }
  0x98   :  { %v175_v24 = vsub.s32 32, %v174_v21  ;;  %v71_v27 = vsub.s32 32, %v676_v20  ;;  %v177_v29 = vshll.u32 %v523_v28, %v174_v21  ;;  %v180_v31 = vshll.u32 %v524_v30, %v174_v21 }
  0x99   :  { %v183_v33 = vshll.u32 %v525_v32, %v174_v21  ;;  %v186_v38 = vshll.u32 %v526_v36, %v174_v21  ;;  %v189_v41 = vshll.u32 %v527_v39, %v174_v21  ;;  %vm192_vm2 = vcmp.lt.s32.totalorder %v173_v22, 1 }
  0x9a   :  { %v178_v34 = vshrl.u32 %v524_v30, %v175_v24  ;;  %v181_v35 = vshrl.u32 %v525_v32, %v175_v24  ;;  %v184_v37 = vshrl.u32 %v526_v36, %v175_v24  ;;  %v187_v40 = vshrl.u32 %v527_v39, %v175_v24 }
  0x9b   :  { %v190_v43 = vshrl.u32 %v528_v42, %v175_v24  ;;  %v176_v44 = vshrl.u32 %v523_v28, %v175_v24  ;;  %vm194_vm3 = vcmp.lt.s32.totalorder %v173_v22, 3  ;;  %vm195_vm4 = vcmp.lt.s32.totalorder %v173_v22, 4 }
  0x9c   :  { %v179_v45 = vor.u32 %v178_v34, %v177_v29  ;;  %v182_v46 = vor.u32 %v181_v35, %v180_v31  ;;  %v185_v47 = vor.u32 %v184_v37, %v183_v33  ;;  %v188_v48 = vor.u32 %v187_v40, %v186_v38 }
  0x9d   :  { %v191_v49 = vor.u32 %v190_v43, %v189_v41  ;;  %v74_v57 = vshrl.u32 %v524_v30, %v71_v27  ;;  %vm193_vm5 = vcmp.lt.s32.totalorder %v173_v22, 2  ;;  %v73_v60 = vshll.u32 %v523_v28, %v676_v20 }
  0x9e   :  { %v196_v50 = vsel %vm192_vm2, %v176_v44, %v179_v45  ;;  %v197_v51 = vsel %vm195_vm4, %v185_v47, 2102212464  ;;  %v200_v52 = vsel %vm192_vm2, %v179_v45, %v182_v46  ;;  %v204_v53 = vsel %vm192_vm2, %v182_v46, %v185_v47 }
  0x9f   :  { %v198_v54 = vsel %vm194_vm3, %v182_v46, %v197_v51  ;;  %v201_v55 = vsel %vm195_vm4, %v188_v48, 920167782  ;;  %v205_v56 = vsel %vm195_vm4, %v191_v49, 1326507024  ;;  %v76_v1 = vshll.u32 %v524_v30, %v676_v20 }
  0xa0   :  { %v202_v58 = vsel %vm194_vm3, %v185_v47, %v201_v55  ;;  %v206_v59 = vsel %vm194_vm3, %v188_v48, %v205_v56  ;;  %v199_v61 = vsel %vm193_vm5, %v196_v50, %v198_v54  ;;  %v75_v10 = vor.u32 %v74_v57, %v73_v60 }
  0xa1   :  { %v203_v62 = vsel %vm193_vm5, %v200_v52, %v202_v58  ;;  %v207_v0 = vsel %vm193_vm5, %v204_v53, %v206_v59  ;;  %v77_v11 = vshrl.u32 %v525_v32, %v71_v27  ;;  %v79_v12 = vshll.u32 %v525_v32, %v676_v20 }
  0xa2   :  { %v688_v4 = vmul.u32.u64.low %v680_v25, %v207_v0  ;;  %v689_v5 = vmul.u32.u64.high %v680_v25, %v207_v0, %v688_v4  ;;  %v692_v8 = vmul.u32.u64.low %v680_v25, %v203_v62  ;;  %v693_v9 = vmul.u32.u64.high %v680_v25, %v203_v62, %v692_v8 }
  0xa3   :  { %v80_v13 = vshrl.u32 %v526_v36, %v71_v27  ;;  %v72_v14 = vshrl.u32 %v523_v28, %v71_v27  ;;  %v82_v15 = vshll.u32 %v526_v36, %v676_v20  ;;  %v83_v16 = vshrl.u32 %v527_v39, %v71_v27 }
  0xa4   :  { %v86_v17 = vshrl.u32 %v528_v42, %v71_v27  ;;  %v215_v18 = vmul.u32 %v680_v25, %v199_v61  ;;  %v78_v19 = vor.u32 %v77_v11, %v76_v1  ;;  %v85_v22 = vshll.u32 %v527_v39, %v676_v20 }
  0xa5   :  { %v81_v21 = vor.u32 %v80_v13, %v79_v12  ;;  %vm217_vm6 = vc.u32 %v689_v5, %v692_v8  ;;  %v218_v24 = vadd.s32 1, %v693_v9  ;;  %v84_v29 = vor.u32 %v83_v16, %v82_v15 }
  0xa6   :  { %vm88_vm7 = vcmp.lt.s32.totalorder %v678_v23, 1  ;;  %v87_v30 = vor.u32 %v86_v17, %v85_v22  ;;  %vm90_vm8 = vcmp.lt.s32.totalorder %v678_v23, 3  ;;  %vm91_vm9 = vcmp.lt.s32.totalorder %v678_v23, 4 }
  0xa7   :  { %v96_v28 = vsel %vm88_vm7, %v75_v10, %v78_v19  ;;  %v219_v27 = vsel %vm217_vm6, %v218_v24, %v693_v9  ;;  %v93_v25 = vsel %vm91_vm9, %v81_v21, 2102212464  ;;  %v97_v31 = vsel %vm91_vm9, %v84_v29, 920167782 }
  0xa8   :  { %v100_v32 = vsel %vm88_vm7, %v78_v19, %v81_v21  ;;  %v220_v33 = vadd.s32 %v219_v27, %v215_v18  ;;  %vm89_vm10 = vcmp.lt.s32.totalorder %v678_v23, 2  ;;  %v98_v20 = vsel %vm90_vm8, %v81_v21, %v97_v31 }
  0xa9   :  { %v101_v34 = vsel %vm91_vm9, %v87_v30, 1326507024  ;;  %v92_v35 = vsel %vm88_vm7, %v72_v14, %v75_v10  ;;  %v94_v36 = vsel %vm90_vm8, %v78_v19, %v93_v25  ;;  %v99_v37 = vsel %vm89_vm10, %v96_v28, %v98_v20 }
  0xaa   :  { %v102_v38 = vsel %vm90_vm8, %v84_v29, %v101_v34  ;;  %v221_v39 = vadd.s32 536870912, %v220_v33  ;;  %v707_v41 = vmul.u32.u64.low %v682_v26, %v99_v37  ;;  %v708_v42 = vmul.u32.u64.high %v682_v26, %v99_v37, %v707_v41 }
  0xab   :  { %v103_v40 = vsel %vm89_vm10, %v100_v32, %v102_v38  ;;  %v95_v46 = vsel %vm89_vm10, %v92_v35, %v94_v36  ;;  %v216_v62 = vadd.s32 %v692_v8, %v689_v5  ;;  %vm252_vm5 = vweird.f32 %v666_v3 }
  0xac   :  { %v711_v43 = vmul.u32.u64.low %v682_v26, %v103_v40  ;;  %v712_v44 = vmul.u32.u64.high %v682_v26, %v103_v40, %v711_v43  ;;  %v222_v45 = vshrl.u32 %v221_v39, 30  ;;  %v114_v23 = vadd.s32 1, %v708_v42 }
  0xad   :  { %v111_v48 = vmul.u32 %v682_v26, %v95_v46  ;;  %vm148_vm9 = vweird.f32 %v664_v2  ;;  %vm379_vm10 = vcmask 261120  }
  0xae   :  { %v223_v47 = vshll.u32 %v222_v45, 30  ;;  %vm113_vm11 = vc.u32 %v712_v44, %v707_v41  ;;  %v112_v19 = vadd.s32 %v707_v41, %v712_v44  ;;  %v246_v8 = vsub.s32 4, %v222_v45 }
  0xaf   :  { %v115_v50 = vsel %vm113_vm11, %v114_v23, %v708_v42 }
  0xb0   :  { %v224_v49 = vsub.s32 %v220_v33, %v223_v47  ;;  %v116_v51 = vadd.s32 %v115_v50, %v111_v48  ;;  %v247_v32 = vsel %vm162_vm14, %v246_v8, %v222_v45 }
  0xb1   :  { %v249_v34 = vsel %vm161_vm15, 0, %v247_v32 }
  0xb2   :  { %v226_v52 = vsub.s32 0, %v224_v49  ;;  %v117_v53 = vadd.s32 536870912, %v116_v51  ;;  %v253_v39 = vadd.s32 3, %v249_v34 }
  0xb4   :  { %v401_v54 = vmin.u32 %v226_v52, %v224_v49  ;;  %v118_v55 = vshrl.u32 %v117_v53, 30  ;;  %v254_v42 = vand.u32 3, %v253_v39 }
  0xb6   :  { %v228_v56 = vclz %v401_v54  ;;  %v119_v57 = vshll.u32 %v118_v55, 30  ;;  %v142_v38 = vsub.s32 4, %v118_v55  ;;  %vm259_vm2 = vcmp.eq.s32.totalorder %v254_v42, 2 }
  0xb7   :  { %vm256_vm3 = vcmp.eq.s32.totalorder %v254_v42, 0  ;;  %vm255_vm4 = vcmp.lt.s32.totalorder %v254_v42, 2 }
  0xb8   :  { %v402_v58 = vadd.s32 4294967294, %v228_v56  ;;  %v120_v59 = vsub.s32 %v116_v51, %v119_v57  ;;  %v143_v41 = vsel %vm58_vm0, %v142_v38, %v118_v55 }
  0xb9   :  { %v145_v45 = vsel %vm57_vm1, 0, %v143_v41 }
  0xba   :  { %vm403_vm12 = vcmp.lt.s32.totalorder %v402_v58, 0  ;;  %v122_v61 = vsub.s32 0, %v120_v59 }
  0xbb   :  { %v231_v60 = vsel %vm403_vm12, 0, %v402_v58 }
  0xbc   :  { %v232_v26 = vsub.s32 32, %v231_v60  ;;  %v236_v0 = vsub.s32 4294967266, %v231_v60  ;;  %v397_v1 = vmin.u32 %v122_v61, %v120_v59  ;;  %v233_v4 = vshll.u32 %v224_v49, %v231_v60 }
  0xbd   :  { %v149_v49 = vadd.s32 3, %v145_v45 }
  0xbe   :  { %v234_v9 = vshrl.u32 %v216_v62, %v232_v26  ;;  %v237_v10 = vadd.s32 127, %v236_v0  ;;  %v124_v11 = vclz %v397_v1  ;;  %v405_v1 = vld [vmem:[%s752_s3 + $0x1] ss:$0 sm:$0xff] }
  0xbf   :  { %v150_v52 = vand.u32 3, %v149_v49 }
  0xc0   :  { %v235_v12 = vor.u32 %v234_v9, %v233_v4  ;;  %v238_v13 = vshll.u32 %v237_v10, 23  ;;  %v398_v14 = vadd.s32 4294967294, %v124_v11 }
  0xc1   :  { %vm155_vm6 = vcmp.eq.s32.totalorder %v150_v52, 2  ;;  %vm152_vm7 = vcmp.eq.s32.totalorder %v150_v52, 0  ;;  %vm151_vm8 = vcmp.lt.s32.totalorder %v150_v52, 2 }
  0xc2   :  { %v239_v15 = vor.u32 4788187, %v238_v13  ;;  %vm399_vm13 = vcmp.lt.s32.totalorder %v398_v14, 0  ;;  %v242_v17 = vcvt.s32.f32 %v235_v12 }
  0xc3   :  { %v127_v18 = vsel %vm399_vm13, 0, %v398_v14 }
  0xc4   :  { %v240_v16 = vand.u32 2147483647, %v239_v15  ;;  %v128_v21 = vsub.s32 32, %v127_v18  ;;  %v132_v22 = vsub.s32 4294967266, %v127_v18  ;;  %v129_v24 = vshll.u32 %v120_v59, %v127_v18 }
  0xc6   :  { %v243_v5 = vmul.f32 %v242_v17, %v240_v16  ;;  %v130_v29 = vshrl.u32 %v112_v19, %v128_v21  ;;  %v133_v30 = vadd.s32 127, %v132_v22 }
  0xc8   :  { %v244_v28 = vxor.u32 2147483648, %v243_v5  ;;  %v131_v27 = vor.u32 %v130_v29, %v129_v24  ;;  %v134_v25 = vshll.u32 %v133_v30, 23 }
  0xca   :  { %v245_v31 = vsel %vm162_vm14, %v244_v28, %v243_v5  ;;  %v135_v20 = vor.u32 4788187, %v134_v25  ;;  %v138_v36 = vcvt.s32.f32 %v131_v27 }
  0xcb   :  { %v248_v33 = vsel %vm161_vm15, %v666_v3, %v245_v31  ;;  %v404_v3 = vld [vmem:[%s752_s3] ss:$0 sm:$0xff] }
  0xcc   :  { %490 = vcosq.f32 %v248_v33  ;;  %v136_v35 = vand.u32 2147483647, %v135_v20  ;;  %v270_v26 = vmul.f32 %v404_v3, %v660_v63 }
  0xcd   :  { %492 = vsinq.f32 %v248_v33 }
  0xce   :  { %v139_v37 = vmul.f32 %v138_v36, %v136_v35 }
  0xd0   :  { %v140_v40 = vxor.u32 2147483648, %v139_v37 }
  0xd2   :  { %v141_v6 = vsel %vm58_vm0, %v140_v40, %v139_v37 }
  0xd3   :  { %v144_v43 = vsel %vm57_vm1, %v664_v2, %v141_v6 }
  0xd4   :  { %494 = vcosq.f32 %v144_v43 }
  0xd5   :  { %496 = vsinq.f32 %v144_v43 }
  0xd6   :  { %v491_v44 = vpop.eup %490 }
  0xd7   :  { %v493_v46 = vpop.eup %492  ;;  %v260_v47 = vxor.u32 2147483648, %v491_v44 }
  0xd8   :  { %v257_v23 = vxor.u32 2147483648, %v493_v46 }
  0xd9   :  { %v261_v48 = vsel %vm259_vm2, %v260_v47, %v493_v46 }
  0xda   :  { %v258_v50 = vsel %vm256_vm3, %v491_v44, %v257_v23 }
  0xdb   :  { %v262_v7 = vsel %vm255_vm4, %v258_v50, %v261_v48 }
  0xdc   :  { %v263_v51 = vsel %vm252_vm5, nan, %v262_v7 }
  0xdd   :  { %367 = vmatprep.mubr.f32.mxu0 %v263_v51 }
  0xde   :  { %v495_v53 = vpop.eup %494 }
  0xdf   :  { %v497_v54 = vpop.eup %496  ;;  %v156_v55 = vxor.u32 2147483648, %v495_v53 }
  0xe0   :  { %v153_v56 = vxor.u32 2147483648, %v497_v54 }
  0xe1   :  { %v157_v57 = vsel %vm155_vm6, %v156_v55, %v497_v54 }
  0xe2   :  { %v154_v58 = vsel %vm152_vm7, %v495_v53, %v153_v56 }
  0xe3   :  { %v158_v59 = vsel %vm151_vm8, %v154_v58, %v157_v57 }
  0xe4   :  { %v159_v60 = vsel %vm148_vm9, nan, %v158_v59 }
  0xe5   :  { %368 = vmatmul.mubr.f32.vlgmr.msra.gmra.mrb[0].mxu0 %v159_v60 }
 0x1b8   :  { %v438_v61 = vpop.f32.mrb[0].mxu0 }
 0x1b9   :  { %v439_v62 = vpop.f32.mrb[1].mxu0 }
 0x1ba   :  { %v440_v0 = vadd.f32 %v439_v62, %v438_v61 }
 0x1bc   :  { %v373_v4 = vadd.f32 %v440_v0, %v270_v26 }
 0x1be   :  { %v378_v2 = vadd.f32 %v405_v1, %v373_v4 }
 0x1c0   :  { %380 = vst.msk [vmem:[#allocation2] sm:$0xff] %vm379_vm10, %v378_v2 }
 0x1c1   :  { %509 = shalt.err (!%p506_p4)
}
 0x1c2   :  { %s510_s11 = scalar_lea.hbm %s753_s4, 128 }
 0x1c3   :  { %p511_p5 = scmp.ne.s32.totalorder %s753_s4, %s510_s11  ;;  %p514_p6 = scmp.lt.u32.totalorder %s510_s11, %s753_s4 }
 0x1c5   :  { %p516_p7 = pnand %p514_p6, %p511_p5 }
 0x1c7   :  { %519 = shalt.err (!%p516_p7)
}
 0x1c8   :  { %390 = dma.vmem_to_hbm [thread:$0]  %s388_s7, 128, %s753_s4, [#allocation3]  }
 0x1c9   :  { %520 = dma.done.wait [#allocation3], 128  }
 0x1ca   :  { %521 = vsyncadd [#allocation3], 4294967168 }
 0x1cb   :  { %394 = vsyncpa [#allocation3], 1 }

</bundles_post_ra>
